<compile_context>
chip_gen: v5e
topology: v5e:2x2
jax: 0.10.0
libtpu: 0.0.40
codegen_flags: <defaults>
</compile_context>

<pallas_src>
import functools

import jax
import jax.numpy as jnp
import numpy as np
from jax import lax
from jax.experimental import pallas as pl
from jax.experimental.pallas import tpu as pltpu

_TINY = 1e-30  # guards divisions / logs so masked (non-positive) lanes stay finite
_ANC = 8       # anchors start at row 8 of the packed (16, T) reg/anchor block


def _round_up(x, m):
    return ((x + m - 1) // m) * m


def _smooth_l1(x):
    ax = jnp.abs(x)
    return jnp.where(ax < 1.0, 0.5 * x * x, ax - 0.5)


def _voxel_loss_kernel(pk_ref, ra_ref, gts_ref, out_ref,
                       acc_pl, acc_nl, acc_np, acc_nn, acc_rg, *,
                       eps, ngt, unrolled):
    i = pl.program_id(1)
    f32 = jnp.float32

    @pl.when(i == 0)
    def _init():
        for acc in (acc_pl, acc_nl, acc_np, acc_nn, acc_rg):
            acc[...] = jnp.zeros_like(acc)

    posf = pk_ref[0:1, :]          # raw positive weights
    negf = pk_ref[1:2, :]
    score = pk_ref[2:3, :]
    gidx = pk_ref[3:4, :]          # gt index stored as exact small floats
    posind = (posf > 0.0).astype(f32)   # == torch.where(pos) indicator

    # ---- classification partial sums (per lane, no concatenates) ----------
    acc_pl[...] += -jnp.log(score + eps) * posf
    acc_nl[...] += -jnp.log(1.0 - score + eps) * negf
    acc_np[...] += posind
    acc_nn[...] += negf

    # ---- gather gts[gi] ----------------------------------------------------
    t = gidx.shape[1]
    if unrolled:
        # small-NGT fast path: select-accumulate, no (kp, T) one-hot at all.
        gt = jnp.zeros((7, t), f32)
        for g in range(ngt):
            col = gts_ref[0:7, g:g + 1]                       # (7, 1)
            gt = gt + jnp.where(gidx == float(g), col, 0.0)   # -> (7, T)
    else:
        # large-NGT fallback: one-hot matmul on the otherwise idle MXU.
        kp = gts_ref.shape[1]
        rowid = lax.broadcasted_iota(f32, (kp, t), 0)
        onehot = (rowid == gidx).astype(f32)
        gt = jnp.dot(gts_ref[...], onehot, preferred_element_type=f32)[0:7, :]

    # ---- regression targets + SmoothL1, per row group ----------------------
    reg01, reg2 = ra_ref[0:2, :], ra_ref[2:3, :]
    reg345, reg6 = ra_ref[3:6, :], ra_ref[6:7, :]
    anc01 = ra_ref[_ANC + 0:_ANC + 2, :]
    anc2 = ra_ref[_ANC + 2:_ANC + 3, :]
    anc3 = ra_ref[_ANC + 3:_ANC + 4, :]
    anc4 = ra_ref[_ANC + 4:_ANC + 5, :]
    anc345 = ra_ref[_ANC + 3:_ANC + 6, :]
    anc5 = ra_ref[_ANC + 5:_ANC + 6, :]
    anc6 = ra_ref[_ANC + 6:_ANC + 7, :]

    inv_d = lax.rsqrt(jnp.maximum(anc3 * anc3 + anc4 * anc4, _TINY))  # EUP
    x01 = reg01 - (gt[0:2, :] - anc01) * inv_d
    x2 = reg2 - (gt[2:3, :] - anc2) / jnp.where(anc5 != 0.0, anc5, _TINY)
    ratio = gt[3:6, :] / jnp.where(anc345 != 0.0, anc345, _TINY)
    x345 = reg345 - jnp.log(jnp.maximum(ratio, _TINY))
    x6 = reg6 - (gt[6:7, :] - anc6)

    contrib = (jnp.sum(_smooth_l1(x01), axis=0, keepdims=True)
               + _smooth_l1(x2)
               + jnp.sum(_smooth_l1(x345), axis=0, keepdims=True)
               + _smooth_l1(x6))
    acc_rg[...] += contrib * posind

    # ---- single cross-lane reduction on the last reduction step ------------
    @pl.when(i == pl.num_programs(1) - 1)
    def _finalize():
        lane = lax.broadcasted_iota(jnp.int32, (1, 1, 128), 2)

        def lane_put(acc, k):
            return jnp.where(lane == k,
                             jnp.sum(acc[...], axis=1, keepdims=True), 0.0)

        out_ref[...] = (lane_put(acc_pl, 0) + lane_put(acc_nl, 1)
                        + lane_put(acc_np, 2) + lane_put(acc_nn, 3)
                        + lane_put(acc_rg, 4))


def voxel_loss2(pos, neg, gi, gts, score, reg, anchors, anchors_per_loc,
                a=1.5, b=1.0, eps=1e-6, tile=16384, num_cores=2,
                unroll_ngt_max=32):
    """JAX/Pallas equivalent of VoxelLoss2.forward (positive-anchor path)."""
    # TODO(synk): the `pos is None` and `npos == 0 -> regLoss=None` branches
    # are Python-level control flow in the PyTorch module; here regLoss is 0
    # when there are no positives.  Positive-anchor compaction via
    # scalar-prefetched indices is also left as future work.
    H, W = score.shape[0], score.shape[1]
    A = anchors_per_loc
    N = H * W * A
    NGT = int(gts.shape[0])
    f32 = jnp.float32
    C = int(num_cores)

    per_core = -(-N // C)
    T = min(int(tile), _round_up(per_core, 128))
    nt = -(-N // (C * T))                 # reduction steps per core
    Np = C * nt * T
    pad = Np - N

    # fused input streams (padding lanes contribute 0: pos=neg=0 -> posind=0)
    gi_f = jnp.clip(gi.reshape(N).astype(jnp.int32), 0, max(NGT - 1, 0)).astype(f32)
    packed4 = jnp.stack([pos.reshape(N).astype(f32),
                         neg.reshape(N).astype(f32),
                         score.reshape(N).astype(f32),
                         gi_f], axis=0)                       # (4, N)
    packed4 = jnp.pad(packed4, ((0, 0), (0, pad)))

    reg_t = jnp.pad(reg.reshape(N, 7).T.astype(f32), ((0, 1), (0, pad)))
    anc_t = jnp.pad(anchors.reshape(N, 7).T.astype(f32), ((0, 1), (0, pad)))
    regan = jnp.concatenate([reg_t, anc_t], axis=0)           # (16, Np)

    kp = _round_up(max(NGT, 1), 128)                          # small, VMEM-resident
    gts_pad = jnp.zeros((8, kp), f32).at[0:7, 0:NGT].set(gts.astype(f32).T)

    lane_map = lambda c, i: (0, c * nt + i)
    grid_spec = pltpu.PrefetchScalarGridSpec(
        num_scalar_prefetch=0,
        grid=(C, nt),
        in_specs=[
            pl.BlockSpec((4, T), lane_map),                   # pos/neg/score/gi
            pl.BlockSpec((16, T), lane_map),                  # reg + anchors
            pl.BlockSpec((8, kp), lambda c, i: (0, 0)),       # gts table
        ],
        out_specs=pl.BlockSpec((1, 1, 128), lambda c, i: (c, 0, 0)),
        scratch_shapes=[pltpu.VMEM((1, T), f32)] * 5,         # per-lane partials
    )

    kernel = functools.partial(_voxel_loss_kernel, eps=float(eps), ngt=NGT,
                               unrolled=NGT <= int(unroll_ngt_max))
    partials = pl.pallas_call(
        kernel,
        out_shape=jax.ShapeDtypeStruct((C, 1, 128), f32),
        grid_spec=grid_spec,
        compiler_params=pltpu.CompilerParams(
            dimension_semantics=("parallel", "arbitrary"),
            vmem_limit_bytes=32 * 1024 * 1024),
    )(packed4, regan, gts_pad)

    tot = jnp.sum(partials, axis=0).reshape(-1)               # combine core partials
    pos_loss_sum, neg_loss_sum, npos, nneg, sl1_sum = (
        tot[0], tot[1], tot[2], tot[3], tot[4])
    cls_loss = a * pos_loss_sum / (npos + eps) + b * neg_loss_sum / (nneg + eps)
    reg_loss = sl1_sum / jnp.maximum(npos * 7.0, 1.0)
    return cls_loss, reg_loss


def _reference(pos, neg, gi, gts, score, reg, anchors, A, a=1.5, b=1.0, eps=1e-6):
    """Pure-JAX reference mirroring the PyTorch math (dense masked form)."""
    pos = pos.astype(jnp.float32)
    neg = neg.astype(jnp.float32)
    npos = (pos > 0).sum().astype(jnp.float32)        # len(torch.where(pos)[0])
    pos_loss = (-jnp.log(score + eps) * pos).sum() / (npos + eps)
    neg_loss = (-jnp.log(1 - score + eps) * neg).sum() / (neg.sum() + eps)
    cls = a * pos_loss + b * neg_loss

    anc = anchors.reshape(*anchors.shape[:2], A, 7)
    rg = reg.reshape(*reg.shape[:2], A, 7)
    gt = gts[jnp.clip(gi, 0, gts.shape[0] - 1)]
    d = jnp.sqrt(anc[..., 3] ** 2 + anc[..., 4] ** 2)[..., None]
    t = jnp.concatenate([
        (gt[..., 0:2] - anc[..., 0:2]) / d,
        ((gt[..., 2] - anc[..., 2]) / anc[..., 5])[..., None],
        jnp.log(gt[..., 3:6] / anc[..., 3:6]),
        (gt[..., 6] - anc[..., 6])[..., None]], axis=-1)
    x = rg - t
    ax = jnp.abs(x)
    sl1 = jnp.where(ax < 1.0, 0.5 * x * x, ax - 0.5)
    sl1 = jnp.where(pos[..., None] > 0, sl1, 0.0)
    regl = sl1.sum() / jnp.maximum(npos * 7.0, 1.0)
    return cls, regl


if __name__ == "__main__":
    key = jax.random.PRNGKey(0)
    H, W, A, NGT = 16, 16, 2, 8
    ks = jax.random.split(key, 10)

    score = jax.random.uniform(ks[0], (H, W, A), minval=0.05, maxval=0.95)
    r = jax.random.uniform(ks[1], (H, W, A))
    pos = (r > 0.9).astype(jnp.float32)            # guaranteed some positives
    neg = (r < 0.5).astype(jnp.float32)
    gi = jax.random.randint(ks[2], (H, W, A), 0, NGT)

    gts = jnp.concatenate([
        jax.random.normal(ks[3], (NGT, 3)),
        jax.random.uniform(ks[4], (NGT, 3), minval=0.5, maxval=3.0),
        jax.random.uniform(ks[5], (NGT, 1), minval=-3.14, maxval=3.14)], axis=-1)

    anchors = jnp.concatenate([
        jax.random.normal(ks[6], (H, W, A, 3)),
        jax.random.uniform(ks[7], (H, W, A, 3), minval=0.5, maxval=3.0),
        jax.random.uniform(ks[8], (H, W, A, 1), minval=-3.14, maxval=3.14)],
        axis=-1).reshape(H, W, A * 7)

    reg = 0.1 * jax.random.normal(ks[9], (H, W, A * 7))

    cls_loss, reg_loss = voxel_loss2(pos, neg, gi, gts, score, reg, anchors, A)
    jax.block_until_ready((cls_loss, reg_loss))

    cls_ref, reg_ref = _reference(pos, neg, gi, gts, score, reg, anchors, A)
    np.testing.assert_allclose(np.array(cls_loss), np.array(cls_ref),
                               rtol=1e-3, atol=1e-4)
    np.testing.assert_allclose(np.array(reg_loss), np.array(reg_ref),
                               rtol=1e-3, atol=1e-4)
    print("KERNEL_OK")
</pallas_src>

<mosaic_0001>
module attributes {stable_mosaic.version = 11 : i64} {
  func.func @_voxel_loss_kernel(%arg0: i32, %arg1: i32, %arg2: memref<4x256xf32, #tpu.memory_space<vmem>>, %arg3: memref<16x256xf32, #tpu.memory_space<vmem>>, %arg4: memref<8x128xf32, #tpu.memory_space<vmem>>, %arg5: memref<1x1x128xf32, #tpu.memory_space<vmem>>, %arg6: memref<1x256xf32, #tpu.memory_space<vmem>>, %arg7: memref<1x256xf32, #tpu.memory_space<vmem>>, %arg8: memref<1x256xf32, #tpu.memory_space<vmem>>, %arg9: memref<1x256xf32, #tpu.memory_space<vmem>>, %arg10: memref<1x256xf32, #tpu.memory_space<vmem>>) attributes {dimension_semantics = [#tpu.dimension_semantics<parallel>, #tpu.dimension_semantics<arbitrary>], iteration_bounds = array<i64: 2, 1>, scalar_prefetch = 0 : i64, scratch_operands = 5 : i64, tpu.core_type = #tpu.core_type<tc>, window_params = [{transform_indices = @transform_0, window_bounds = array<i64: 4, 256>}, {transform_indices = @transform_1, window_bounds = array<i64: 16, 256>}, {pipeline_mode = #tpu.pipeline_mode<synchronous>, transform_indices = @transform_2, window_bounds = array<i64: 8, 128>}, {transform_indices = @transform_3, window_bounds = array<i64: 1, 1, 128>}]} {
    %c0_i32 = arith.constant 0 : i32
    %0 = arith.cmpi eq, %arg1, %c0_i32 : i32
    %1 = arith.extui %0 : i1 to i32
    %c0_i32_0 = arith.constant 0 : i32
    %2 = arith.cmpi ne, %1, %c0_i32_0 : i32
    scf.if %2 {
      %cst_97 = arith.constant 0.000000e+00 : f32
      %211 = vector.broadcast %cst_97 : f32 to vector<1x256xf32>
      %c0_98 = arith.constant 0 : index
      %c0_99 = arith.constant 0 : index
      %212 = vector.load %arg6[%c0_98, %c0_99] : memref<1x256xf32, #tpu.memory_space<vmem>>, vector<1x256xf32>
      tpu.vector_store %arg6[%c0_98, %c0_99], %211 {strides = array<i32>} : memref<1x256xf32, #tpu.memory_space<vmem>>, vector<1x256xf32>,
      %cst_100 = arith.constant 0.000000e+00 : f32
      %213 = vector.broadcast %cst_100 : f32 to vector<1x256xf32>
      %c0_101 = arith.constant 0 : index
      %c0_102 = arith.constant 0 : index
      %214 = vector.load %arg7[%c0_101, %c0_102] : memref<1x256xf32, #tpu.memory_space<vmem>>, vector<1x256xf32>
      tpu.vector_store %arg7[%c0_101, %c0_102], %213 {strides = array<i32>} : memref<1x256xf32, #tpu.memory_space<vmem>>, vector<1x256xf32>,
      %cst_103 = arith.constant 0.000000e+00 : f32
      %215 = vector.broadcast %cst_103 : f32 to vector<1x256xf32>
      %c0_104 = arith.constant 0 : index
      %c0_105 = arith.constant 0 : index
      %216 = vector.load %arg8[%c0_104, %c0_105] : memref<1x256xf32, #tpu.memory_space<vmem>>, vector<1x256xf32>
      tpu.vector_store %arg8[%c0_104, %c0_105], %215 {strides = array<i32>} : memref<1x256xf32, #tpu.memory_space<vmem>>, vector<1x256xf32>,
      %cst_106 = arith.constant 0.000000e+00 : f32
      %217 = vector.broadcast %cst_106 : f32 to vector<1x256xf32>
      %c0_107 = arith.constant 0 : index
      %c0_108 = arith.constant 0 : index
      %218 = vector.load %arg9[%c0_107, %c0_108] : memref<1x256xf32, #tpu.memory_space<vmem>>, vector<1x256xf32>
      tpu.vector_store %arg9[%c0_107, %c0_108], %217 {strides = array<i32>} : memref<1x256xf32, #tpu.memory_space<vmem>>, vector<1x256xf32>,
      %cst_109 = arith.constant 0.000000e+00 : f32
      %219 = vector.broadcast %cst_109 : f32 to vector<1x256xf32>
      %c0_110 = arith.constant 0 : index
      %c0_111 = arith.constant 0 : index
      %220 = vector.load %arg10[%c0_110, %c0_111] : memref<1x256xf32, #tpu.memory_space<vmem>>, vector<1x256xf32>
      tpu.vector_store %arg10[%c0_110, %c0_111], %219 {strides = array<i32>} : memref<1x256xf32, #tpu.memory_space<vmem>>, vector<1x256xf32>,
    } else {
    }
    %c0 = arith.constant 0 : index
    %c0_1 = arith.constant 0 : index
    %3 = vector.load %arg2[%c0, %c0_1] : memref<4x256xf32, #tpu.memory_space<vmem>>, vector<1x256xf32>
    %c1 = arith.constant 1 : index
    %c0_2 = arith.constant 0 : index
    %4 = vector.load %arg2[%c1, %c0_2] : memref<4x256xf32, #tpu.memory_space<vmem>>, vector<1x256xf32>
    %c2 = arith.constant 2 : index
    %c0_3 = arith.constant 0 : index
    %5 = vector.load %arg2[%c2, %c0_3] : memref<4x256xf32, #tpu.memory_space<vmem>>, vector<1x256xf32>
    %c3 = arith.constant 3 : index
    %c0_4 = arith.constant 0 : index
    %6 = vector.load %arg2[%c3, %c0_4] : memref<4x256xf32, #tpu.memory_space<vmem>>, vector<1x256xf32>
    %cst = arith.constant 0.000000e+00 : f32
    %7 = vector.broadcast %cst : f32 to vector<1x256xf32>
    %8 = arith.cmpf ogt, %3, %7 : vector<1x256xf32>
    %9 = arith.extui %8 : vector<1x256xi1> to vector<1x256xi32>
    %10 = arith.sitofp %9 : vector<1x256xi32> to vector<1x256xf32>
    %c0_5 = arith.constant 0 : index
    %c0_6 = arith.constant 0 : index
    %11 = vector.load %arg6[%c0_5, %c0_6] : memref<1x256xf32, #tpu.memory_space<vmem>>, vector<1x256xf32>
    %cst_7 = arith.constant 9.99999997E-7 : f32
    %12 = vector.broadcast %cst_7 : f32 to vector<1x256xf32>
    %13 = arith.addf %5, %12 : vector<1x256xf32>
    %14 = math.log %13 : vector<1x256xf32>
    %cst_8 = arith.constant 0.000000e+00 : f32
    %15 = vector.broadcast %cst_8 : f32 to vector<1x256xf32>
    %16 = arith.subf %15, %14 : vector<1x256xf32>
    %17 = arith.mulf %16, %3 : vector<1x256xf32>
    %18 = arith.addf %11, %17 : vector<1x256xf32>
    %c0_9 = arith.constant 0 : index
    %c0_10 = arith.constant 0 : index
    %19 = vector.load %arg6[%c0_9, %c0_10] : memref<1x256xf32, #tpu.memory_space<vmem>>, vector<1x256xf32>
    tpu.vector_store %arg6[%c0_9, %c0_10], %18 {strides = array<i32>} : memref<1x256xf32, #tpu.memory_space<vmem>>, vector<1x256xf32>,
    %c0_11 = arith.constant 0 : index
    %c0_12 = arith.constant 0 : index
    %20 = vector.load %arg7[%c0_11, %c0_12] : memref<1x256xf32, #tpu.memory_space<vmem>>, vector<1x256xf32>
    %cst_13 = arith.constant 1.000000e+00 : f32
    %21 = vector.broadcast %cst_13 : f32 to vector<1x256xf32>
    %22 = arith.subf %21, %5 : vector<1x256xf32>
    %cst_14 = arith.constant 9.99999997E-7 : f32
    %23 = vector.broadcast %cst_14 : f32 to vector<1x256xf32>
    %24 = arith.addf %22, %23 : vector<1x256xf32>
    %25 = math.log %24 : vector<1x256xf32>
    %cst_15 = arith.constant 0.000000e+00 : f32
    %26 = vector.broadcast %cst_15 : f32 to vector<1x256xf32>
    %27 = arith.subf %26, %25 : vector<1x256xf32>
    %28 = arith.mulf %27, %4 : vector<1x256xf32>
    %29 = arith.addf %20, %28 : vector<1x256xf32>
    %c0_16 = arith.constant 0 : index
    %c0_17 = arith.constant 0 : index
    %30 = vector.load %arg7[%c0_16, %c0_17] : memref<1x256xf32, #tpu.memory_space<vmem>>, vector<1x256xf32>
    tpu.vector_store %arg7[%c0_16, %c0_17], %29 {strides = array<i32>} : memref<1x256xf32, #tpu.memory_space<vmem>>, vector<1x256xf32>,
    %c0_18 = arith.constant 0 : index
    %c0_19 = arith.constant 0 : index
    %31 = vector.load %arg8[%c0_18, %c0_19] : memref<1x256xf32, #tpu.memory_space<vmem>>, vector<1x256xf32>
    %32 = arith.addf %31, %10 : vector<1x256xf32>
    %c0_20 = arith.constant 0 : index
    %c0_21 = arith.constant 0 : index
    %33 = vector.load %arg8[%c0_20, %c0_21] : memref<1x256xf32, #tpu.memory_space<vmem>>, vector<1x256xf32>
    tpu.vector_store %arg8[%c0_20, %c0_21], %32 {strides = array<i32>} : memref<1x256xf32, #tpu.memory_space<vmem>>, vector<1x256xf32>,
    %c0_22 = arith.constant 0 : index
    %c0_23 = arith.constant 0 : index
    %34 = vector.load %arg9[%c0_22, %c0_23] : memref<1x256xf32, #tpu.memory_space<vmem>>, vector<1x256xf32>
    %35 = arith.addf %34, %4 : vector<1x256xf32>
    %c0_24 = arith.constant 0 : index
    %c0_25 = arith.constant 0 : index
    %36 = vector.load %arg9[%c0_24, %c0_25] : memref<1x256xf32, #tpu.memory_space<vmem>>, vector<1x256xf32>
    tpu.vector_store %arg9[%c0_24, %c0_25], %35 {strides = array<i32>} : memref<1x256xf32, #tpu.memory_space<vmem>>, vector<1x256xf32>,
    %cst_26 = arith.constant 0.000000e+00 : f32
    %37 = vector.broadcast %cst_26 : f32 to vector<7x256xf32>
    %c0_27 = arith.constant 0 : index
    %c0_28 = arith.constant 0 : index
    %38 = vector.load %arg4[%c0_27, %c0_28] : memref<8x128xf32, #tpu.memory_space<vmem>>, vector<7x1xf32>
    %cst_29 = arith.constant 0.000000e+00 : f32
    %39 = vector.broadcast %cst_29 : f32 to vector<1x256xf32>
    %40 = arith.cmpf oeq, %6, %39 : vector<1x256xf32>
    %cst_30 = arith.constant 0.000000e+00 : f32
    %41 = vector.shape_cast %40 : vector<1x256xi1> to vector<1x256xi1>
    %42 = vector.broadcast %41 : vector<1x256xi1> to vector<7x256xi1>
    %43 = vector.shape_cast %38 : vector<7x1xf32> to vector<7x1xf32>
    %44 = vector.broadcast %43 : vector<7x1xf32> to vector<7x256xf32>
    %45 = vector.broadcast %cst_30 : f32 to vector<7x256xf32>
    %46 = arith.select %42, %44, %45 : vector<7x256xi1>, vector<7x256xf32>
    %47 = arith.addf %37, %46 : vector<7x256xf32>
    %c0_31 = arith.constant 0 : index
    %c1_32 = arith.constant 1 : index
    %48 = vector.load %arg4[%c0_31, %c1_32] : memref<8x128xf32, #tpu.memory_space<vmem>>, vector<7x1xf32>
    %cst_33 = arith.constant 1.000000e+00 : f32
    %49 = vector.broadcast %cst_33 : f32 to vector<1x256xf32>
    %50 = arith.cmpf oeq, %6, %49 : vector<1x256xf32>
    %cst_34 = arith.constant 0.000000e+00 : f32
    %51 = vector.shape_cast %50 : vector<1x256xi1> to vector<1x256xi1>
    %52 = vector.broadcast %51 : vector<1x256xi1> to vector<7x256xi1>
    %53 = vector.shape_cast %48 : vector<7x1xf32> to vector<7x1xf32>
    %54 = vector.broadcast %53 : vector<7x1xf32> to vector<7x256xf32>
    %55 = vector.broadcast %cst_34 : f32 to vector<7x256xf32>
    %56 = arith.select %52, %54, %55 : vector<7x256xi1>, vector<7x256xf32>
    %57 = arith.addf %47, %56 : vector<7x256xf32>
    %c0_35 = arith.constant 0 : index
    %c2_36 = arith.constant 2 : index
    %58 = vector.load %arg4[%c0_35, %c2_36] : memref<8x128xf32, #tpu.memory_space<vmem>>, vector<7x1xf32>
    %cst_37 = arith.constant 2.000000e+00 : f32
    %59 = vector.broadcast %cst_37 : f32 to vector<1x256xf32>
    %60 = arith.cmpf oeq, %6, %59 : vector<1x256xf32>
    %cst_38 = arith.constant 0.000000e+00 : f32
    %61 = vector.shape_cast %60 : vector<1x256xi1> to vector<1x256xi1>
    %62 = vector.broadcast %61 : vector<1x256xi1> to vector<7x256xi1>
    %63 = vector.shape_cast %58 : vector<7x1xf32> to vector<7x1xf32>
    %64 = vector.broadcast %63 : vector<7x1xf32> to vector<7x256xf32>
    %65 = vector.broadcast %cst_38 : f32 to vector<7x256xf32>
    %66 = arith.select %62, %64, %65 : vector<7x256xi1>, vector<7x256xf32>
    %67 = arith.addf %57, %66 : vector<7x256xf32>
    %c0_39 = arith.constant 0 : index
    %c3_40 = arith.constant 3 : index
    %68 = vector.load %arg4[%c0_39, %c3_40] : memref<8x128xf32, #tpu.memory_space<vmem>>, vector<7x1xf32>
    %cst_41 = arith.constant 3.000000e+00 : f32
    %69 = vector.broadcast %cst_41 : f32 to vector<1x256xf32>
    %70 = arith.cmpf oeq, %6, %69 : vector<1x256xf32>
    %cst_42 = arith.constant 0.000000e+00 : f32
    %71 = vector.shape_cast %70 : vector<1x256xi1> to vector<1x256xi1>
    %72 = vector.broadcast %71 : vector<1x256xi1> to vector<7x256xi1>
    %73 = vector.shape_cast %68 : vector<7x1xf32> to vector<7x1xf32>
    %74 = vector.broadcast %73 : vector<7x1xf32> to vector<7x256xf32>
    %75 = vector.broadcast %cst_42 : f32 to vector<7x256xf32>
    %76 = arith.select %72, %74, %75 : vector<7x256xi1>, vector<7x256xf32>
    %77 = arith.addf %67, %76 : vector<7x256xf32>
    %c0_43 = arith.constant 0 : index
    %c4 = arith.constant 4 : index
    %78 = vector.load %arg4[%c0_43, %c4] : memref<8x128xf32, #tpu.memory_space<vmem>>, vector<7x1xf32>
    %cst_44 = arith.constant 4.000000e+00 : f32
    %79 = vector.broadcast %cst_44 : f32 to vector<1x256xf32>
    %80 = arith.cmpf oeq, %6, %79 : vector<1x256xf32>
    %cst_45 = arith.constant 0.000000e+00 : f32
    %81 = vector.shape_cast %80 : vector<1x256xi1> to vector<1x256xi1>
    %82 = vector.broadcast %81 : vector<1x256xi1> to vector<7x256xi1>
    %83 = vector.shape_cast %78 : vector<7x1xf32> to vector<7x1xf32>
    %84 = vector.broadcast %83 : vector<7x1xf32> to vector<7x256xf32>
    %85 = vector.broadcast %cst_45 : f32 to vector<7x256xf32>
    %86 = arith.select %82, %84, %85 : vector<7x256xi1>, vector<7x256xf32>
    %87 = arith.addf %77, %86 : vector<7x256xf32>
    %c0_46 = arith.constant 0 : index
    %c5 = arith.constant 5 : index
    %88 = vector.load %arg4[%c0_46, %c5] : memref<8x128xf32, #tpu.memory_space<vmem>>, vector<7x1xf32>
    %cst_47 = arith.constant 5.000000e+00 : f32
    %89 = vector.broadcast %cst_47 : f32 to vector<1x256xf32>
    %90 = arith.cmpf oeq, %6, %89 : vector<1x256xf32>
    %cst_48 = arith.constant 0.000000e+00 : f32
    %91 = vector.shape_cast %90 : vector<1x256xi1> to vector<1x256xi1>
    %92 = vector.broadcast %91 : vector<1x256xi1> to vector<7x256xi1>
    %93 = vector.shape_cast %88 : vector<7x1xf32> to vector<7x1xf32>
    %94 = vector.broadcast %93 : vector<7x1xf32> to vector<7x256xf32>
    %95 = vector.broadcast %cst_48 : f32 to vector<7x256xf32>
    %96 = arith.select %92, %94, %95 : vector<7x256xi1>, vector<7x256xf32>
    %97 = arith.addf %87, %96 : vector<7x256xf32>
    %c0_49 = arith.constant 0 : index
    %c6 = arith.constant 6 : index
    %98 = vector.load %arg4[%c0_49, %c6] : memref<8x128xf32, #tpu.memory_space<vmem>>, vector<7x1xf32>
    %cst_50 = arith.constant 6.000000e+00 : f32
    %99 = vector.broadcast %cst_50 : f32 to vector<1x256xf32>
    %100 = arith.cmpf oeq, %6, %99 : vector<1x256xf32>
    %cst_51 = arith.constant 0.000000e+00 : f32
    %101 = vector.shape_cast %100 : vector<1x256xi1> to vector<1x256xi1>
    %102 = vector.broadcast %101 : vector<1x256xi1> to vector<7x256xi1>
    %103 = vector.shape_cast %98 : vector<7x1xf32> to vector<7x1xf32>
    %104 = vector.broadcast %103 : vector<7x1xf32> to vector<7x256xf32>
    %105 = vector.broadcast %cst_51 : f32 to vector<7x256xf32>
    %106 = arith.select %102, %104, %105 : vector<7x256xi1>, vector<7x256xf32>
    %107 = arith.addf %97, %106 : vector<7x256xf32>
    %c0_52 = arith.constant 0 : index
    %c7 = arith.constant 7 : index
    %108 = vector.load %arg4[%c0_52, %c7] : memref<8x128xf32, #tpu.memory_space<vmem>>, vector<7x1xf32>
    %cst_53 = arith.constant 7.000000e+00 : f32
    %109 = vector.broadcast %cst_53 : f32 to vector<1x256xf32>
    %110 = arith.cmpf oeq, %6, %109 : vector<1x256xf32>
    %cst_54 = arith.constant 0.000000e+00 : f32
    %111 = vector.shape_cast %110 : vector<1x256xi1> to vector<1x256xi1>
    %112 = vector.broadcast %111 : vector<1x256xi1> to vector<7x256xi1>
    %113 = vector.shape_cast %108 : vector<7x1xf32> to vector<7x1xf32>
    %114 = vector.broadcast %113 : vector<7x1xf32> to vector<7x256xf32>
    %115 = vector.broadcast %cst_54 : f32 to vector<7x256xf32>
    %116 = arith.select %112, %114, %115 : vector<7x256xi1>, vector<7x256xf32>
    %117 = arith.addf %107, %116 : vector<7x256xf32>
    %c0_55 = arith.constant 0 : index
    %c0_56 = arith.constant 0 : index
    %118 = vector.load %arg3[%c0_55, %c0_56] : memref<16x256xf32, #tpu.memory_space<vmem>>, vector<2x256xf32>
    %c2_57 = arith.constant 2 : index
    %c0_58 = arith.constant 0 : index
    %119 = vector.load %arg3[%c2_57, %c0_58] : memref<16x256xf32, #tpu.memory_space<vmem>>, vector<1x256xf32>
    %c3_59 = arith.constant 3 : index
    %c0_60 = arith.constant 0 : index
    %120 = vector.load %arg3[%c3_59, %c0_60] : memref<16x256xf32, #tpu.memory_space<vmem>>, vector<3x256xf32>
    %c6_61 = arith.constant 6 : index
    %c0_62 = arith.constant 0 : index
    %121 = vector.load %arg3[%c6_61, %c0_62] : memref<16x256xf32, #tpu.memory_space<vmem>>, vector<1x256xf32>
    %c8 = arith.constant 8 : index
    %c0_63 = arith.constant 0 : index
    %122 = vector.load %arg3[%c8, %c0_63] : memref<16x256xf32, #tpu.memory_space<vmem>>, vector<2x256xf32>
    %c10 = arith.constant 10 : index
    %c0_64 = arith.constant 0 : index
    %123 = vector.load %arg3[%c10, %c0_64] : memref<16x256xf32, #tpu.memory_space<vmem>>, vector<1x256xf32>
    %c11 = arith.constant 11 : index
    %c0_65 = arith.constant 0 : index
    %124 = vector.load %arg3[%c11, %c0_65] : memref<16x256xf32, #tpu.memory_space<vmem>>, vector<1x256xf32>
    %c12 = arith.constant 12 : index
    %c0_66 = arith.constant 0 : index
    %125 = vector.load %arg3[%c12, %c0_66] : memref<16x256xf32, #tpu.memory_space<vmem>>, vector<1x256xf32>
    %c11_67 = arith.constant 11 : index
    %c0_68 = arith.constant 0 : index
    %126 = vector.load %arg3[%c11_67, %c0_68] : memref<16x256xf32, #tpu.memory_space<vmem>>, vector<3x256xf32>
    %c13 = arith.constant 13 : index
    %c0_69 = arith.constant 0 : index
    %127 = vector.load %arg3[%c13, %c0_69] : memref<16x256xf32, #tpu.memory_space<vmem>>, vector<1x256xf32>
    %c14 = arith.constant 14 : index
    %c0_70 = arith.constant 0 : index
    %128 = vector.load %arg3[%c14, %c0_70] : memref<16x256xf32, #tpu.memory_space<vmem>>, vector<1x256xf32>
    %129 = arith.mulf %124, %124 : vector<1x256xf32>
    %130 = arith.mulf %125, %125 : vector<1x256xf32>
    %131 = arith.addf %129, %130 : vector<1x256xf32>
    %cst_71 = arith.constant 1.000000e-30 : f32
    %132 = vector.broadcast %cst_71 : f32 to vector<1x256xf32>
    %133 = arith.maximumf %131, %132 : vector<1x256xf32>
    %134 = math.rsqrt %133 : vector<1x256xf32>
    %135 = vector.extract_strided_slice %117 {offsets = [0, 0], sizes = [2, 256], strides = [1, 1]} : vector<7x256xf32> to vector<2x256xf32>
    %136 = arith.subf %135, %122 : vector<2x256xf32>
    %137 = vector.broadcast %134 : vector<1x256xf32> to vector<2x256xf32>
    %138 = arith.mulf %136, %137 : vector<2x256xf32>
    %139 = arith.subf %118, %138 : vector<2x256xf32>
    %140 = vector.extract_strided_slice %117 {offsets = [2, 0], sizes = [1, 256], strides = [1, 1]} : vector<7x256xf32> to vector<1x256xf32>
    %141 = arith.subf %140, %123 : vector<1x256xf32>
    %cst_72 = arith.constant 0.000000e+00 : f32
    %142 = vector.broadcast %cst_72 : f32 to vector<1x256xf32>
    %143 = arith.cmpf one, %127, %142 : vector<1x256xf32>
    %cst_73 = arith.constant 1.000000e-30 : f32
    %144 = vector.broadcast %cst_73 : f32 to vector<1x256xf32>
    %145 = arith.select %143, %127, %144 : vector<1x256xi1>, vector<1x256xf32>
    %146 = arith.divf %141, %145 : vector<1x256xf32>
    %147 = arith.subf %119, %146 : vector<1x256xf32>
    %148 = vector.extract_strided_slice %117 {offsets = [3, 0], sizes = [3, 256], strides = [1, 1]} : vector<7x256xf32> to vector<3x256xf32>
    %cst_74 = arith.constant 0.000000e+00 : f32
    %149 = vector.broadcast %cst_74 : f32 to vector<3x256xf32>
    %150 = arith.cmpf one, %126, %149 : vector<3x256xf32>
    %cst_75 = arith.constant 1.000000e-30 : f32
    %151 = vector.broadcast %cst_75 : f32 to vector<3x256xf32>
    %152 = arith.select %150, %126, %151 : vector<3x256xi1>, vector<3x256xf32>
    %153 = arith.divf %148, %152 : vector<3x256xf32>
    %cst_76 = arith.constant 1.000000e-30 : f32
    %154 = vector.broadcast %cst_76 : f32 to vector<3x256xf32>
    %155 = arith.maximumf %153, %154 : vector<3x256xf32>
    %156 = math.log %155 : vector<3x256xf32>
    %157 = arith.subf %120, %156 : vector<3x256xf32>
    %158 = vector.extract_strided_slice %117 {offsets = [6, 0], sizes = [1, 256], strides = [1, 1]} : vector<7x256xf32> to vector<1x256xf32>
    %159 = arith.subf %158, %128 : vector<1x256xf32>
    %160 = arith.subf %121, %159 : vector<1x256xf32>
    %161 = math.absf %139 : vector<2x256xf32>
    %cst_77 = arith.constant 1.000000e+00 : f32
    %162 = vector.broadcast %cst_77 : f32 to vector<2x256xf32>
    %163 = arith.cmpf olt, %161, %162 : vector<2x256xf32>
    %cst_78 = arith.constant 5.000000e-01 : f32
    %164 = vector.broadcast %cst_78 : f32 to vector<2x256xf32>
    %165 = arith.mulf %164, %139 : vector<2x256xf32>
    %166 = arith.mulf %165, %139 : vector<2x256xf32>
    %cst_79 = arith.constant 5.000000e-01 : f32
    %167 = vector.broadcast %cst_79 : f32 to vector<2x256xf32>
    %168 = arith.subf %161, %167 : vector<2x256xf32>
    %169 = arith.select %163, %166, %168 : vector<2x256xi1>, vector<2x256xf32>
    %cst_80 = arith.constant dense<0.000000e+00> : vector<256xf32>
    %170 = vector.multi_reduction <add>, %169, %cst_80 [0] : vector<2x256xf32> to vector<256xf32>
    %171 = vector.shape_cast %170 : vector<256xf32> to vector<1x256xf32>
    %172 = math.absf %147 : vector<1x256xf32>
    %cst_81 = arith.constant 1.000000e+00 : f32
    %173 = vector.broadcast %cst_81 : f32 to vector<1x256xf32>
    %174 = arith.cmpf olt, %172, %173 : vector<1x256xf32>
    %cst_82 = arith.constant 5.000000e-01 : f32
    %175 = vector.broadcast %cst_82 : f32 to vector<1x256xf32>
    %176 = arith.mulf %175, %147 : vector<1x256xf32>
    %177 = arith.mulf %176, %147 : vector<1x256xf32>
    %cst_83 = arith.constant 5.000000e-01 : f32
    %178 = vector.broadcast %cst_83 : f32 to vector<1x256xf32>
    %179 = arith.subf %172, %178 : vector<1x256xf32>
    %180 = arith.select %174, %177, %179 : vector<1x256xi1>, vector<1x256xf32>
    %181 = arith.addf %171, %180 : vector<1x256xf32>
    %182 = math.absf %157 : vector<3x256xf32>
    %cst_84 = arith.constant 1.000000e+00 : f32
    %183 = vector.broadcast %cst_84 : f32 to vector<3x256xf32>
    %184 = arith.cmpf olt, %182, %183 : vector<3x256xf32>
    %cst_85 = arith.constant 5.000000e-01 : f32
    %185 = vector.broadcast %cst_85 : f32 to vector<3x256xf32>
    %186 = arith.mulf %185, %157 : vector<3x256xf32>
    %187 = arith.mulf %186, %157 : vector<3x256xf32>
    %cst_86 = arith.constant 5.000000e-01 : f32
    %188 = vector.broadcast %cst_86 : f32 to vector<3x256xf32>
    %189 = arith.subf %182, %188 : vector<3x256xf32>
    %190 = arith.select %184, %187, %189 : vector<3x256xi1>, vector<3x256xf32>
    %cst_87 = arith.constant dense<0.000000e+00> : vector<256xf32>
    %191 = vector.multi_reduction <add>, %190, %cst_87 [0] : vector<3x256xf32> to vector<256xf32>
    %192 = vector.shape_cast %191 : vector<256xf32> to vector<1x256xf32>
    %193 = arith.addf %181, %192 : vector<1x256xf32>
    %194 = math.absf %160 : vector<1x256xf32>
    %cst_88 = arith.constant 1.000000e+00 : f32
    %195 = vector.broadcast %cst_88 : f32 to vector<1x256xf32>
    %196 = arith.cmpf olt, %194, %195 : vector<1x256xf32>
    %cst_89 = arith.constant 5.000000e-01 : f32
    %197 = vector.broadcast %cst_89 : f32 to vector<1x256xf32>
    %198 = arith.mulf %197, %160 : vector<1x256xf32>
    %199 = arith.mulf %198, %160 : vector<1x256xf32>
    %cst_90 = arith.constant 5.000000e-01 : f32
    %200 = vector.broadcast %cst_90 : f32 to vector<1x256xf32>
    %201 = arith.subf %194, %200 : vector<1x256xf32>
    %202 = arith.select %196, %199, %201 : vector<1x256xi1>, vector<1x256xf32>
    %203 = arith.addf %193, %202 : vector<1x256xf32>
    %c0_91 = arith.constant 0 : index
    %c0_92 = arith.constant 0 : index
    %204 = vector.load %arg10[%c0_91, %c0_92] : memref<1x256xf32, #tpu.memory_space<vmem>>, vector<1x256xf32>
    %205 = arith.mulf %203, %10 : vector<1x256xf32>
    %206 = arith.addf %204, %205 : vector<1x256xf32>
    %c0_93 = arith.constant 0 : index
    %c0_94 = arith.constant 0 : index
    %207 = vector.load %arg10[%c0_93, %c0_94] : memref<1x256xf32, #tpu.memory_space<vmem>>, vector<1x256xf32>
    tpu.vector_store %arg10[%c0_93, %c0_94], %206 {strides = array<i32>} : memref<1x256xf32, #tpu.memory_space<vmem>>, vector<1x256xf32>,
    %c0_i32_95 = arith.constant 0 : i32
    %208 = arith.cmpi eq, %arg1, %c0_i32_95 : i32
    %209 = arith.extui %208 : i1 to i32
    %c0_i32_96 = arith.constant 0 : i32
    %210 = arith.cmpi ne, %209, %c0_i32_96 : i32
    scf.if %210 {
      %211 = tpu.iota {dimensions = array<i32: 2>} : vector<1x1x128xi32>
      %c0_i32_97 = arith.constant 0 : i32
      %212 = vector.broadcast %c0_i32_97 : i32 to vector<1x1x128xi32>
      %213 = arith.cmpi eq, %211, %212 : vector<1x1x128xi32>
      %c0_98 = arith.constant 0 : index
      %c0_99 = arith.constant 0 : index
      %214 = vector.load %arg6[%c0_98, %c0_99] : memref<1x256xf32, #tpu.memory_space<vmem>>, vector<1x256xf32>
      %cst_100 = arith.constant dense<0.000000e+00> : vector<1xf32>
      %215 = vector.multi_reduction <add>, %214, %cst_100 [1] : vector<1x256xf32> to vector<1xf32>
      %216 = vector.shape_cast %215 : vector<1xf32> to vector<1x1xf32>
      %cst_101 = arith.constant 0.000000e+00 : f32
      %217 = vector.shape_cast %216 : vector<1x1xf32> to vector<1x1x1xf32>
      %218 = vector.broadcast %217 : vector<1x1x1xf32> to vector<1x1x128xf32>
      %219 = vector.broadcast %cst_101 : f32 to vector<1x1x128xf32>
      %220 = arith.select %213, %218, %219 : vector<1x1x128xi1>, vector<1x1x128xf32>
      %c1_i32 = arith.constant 1 : i32
      %221 = vector.broadcast %c1_i32 : i32 to vector<1x1x128xi32>
      %222 = arith.cmpi eq, %211, %221 : vector<1x1x128xi32>
      %c0_102 = arith.constant 0 : index
      %c0_103 = arith.constant 0 : index
      %223 = vector.load %arg7[%c0_102, %c0_103] : memref<1x256xf32, #tpu.memory_space<vmem>>, vector<1x256xf32>
      %cst_104 = arith.constant dense<0.000000e+00> : vector<1xf32>
      %224 = vector.multi_reduction <add>, %223, %cst_104 [1] : vector<1x256xf32> to vector<1xf32>
      %225 = vector.shape_cast %224 : vector<1xf32> to vector<1x1xf32>
      %cst_105 = arith.constant 0.000000e+00 : f32
      %226 = vector.shape_cast %225 : vector<1x1xf32> to vector<1x1x1xf32>
      %227 = vector.broadcast %226 : vector<1x1x1xf32> to vector<1x1x128xf32>
      %228 = vector.broadcast %cst_105 : f32 to vector<1x1x128xf32>
      %229 = arith.select %222, %227, %228 : vector<1x1x128xi1>, vector<1x1x128xf32>
      %230 = arith.addf %220, %229 : vector<1x1x128xf32>
      %c2_i32 = arith.constant 2 : i32
      %231 = vector.broadcast %c2_i32 : i32 to vector<1x1x128xi32>
      %232 = arith.cmpi eq, %211, %231 : vector<1x1x128xi32>
      %c0_106 = arith.constant 0 : index
      %c0_107 = arith.constant 0 : index
      %233 = vector.load %arg8[%c0_106, %c0_107] : memref<1x256xf32, #tpu.memory_space<vmem>>, vector<1x256xf32>
      %cst_108 = arith.constant dense<0.000000e+00> : vector<1xf32>
      %234 = vector.multi_reduction <add>, %233, %cst_108 [1] : vector<1x256xf32> to vector<1xf32>
      %235 = vector.shape_cast %234 : vector<1xf32> to vector<1x1xf32>
      %cst_109 = arith.constant 0.000000e+00 : f32
      %236 = vector.shape_cast %235 : vector<1x1xf32> to vector<1x1x1xf32>
      %237 = vector.broadcast %236 : vector<1x1x1xf32> to vector<1x1x128xf32>
      %238 = vector.broadcast %cst_109 : f32 to vector<1x1x128xf32>
      %239 = arith.select %232, %237, %238 : vector<1x1x128xi1>, vector<1x1x128xf32>
      %240 = arith.addf %230, %239 : vector<1x1x128xf32>
      %c3_i32 = arith.constant 3 : i32
      %241 = vector.broadcast %c3_i32 : i32 to vector<1x1x128xi32>
      %242 = arith.cmpi eq, %211, %241 : vector<1x1x128xi32>
      %c0_110 = arith.constant 0 : index
      %c0_111 = arith.constant 0 : index
      %243 = vector.load %arg9[%c0_110, %c0_111] : memref<1x256xf32, #tpu.memory_space<vmem>>, vector<1x256xf32>
      %cst_112 = arith.constant dense<0.000000e+00> : vector<1xf32>
      %244 = vector.multi_reduction <add>, %243, %cst_112 [1] : vector<1x256xf32> to vector<1xf32>
      %245 = vector.shape_cast %244 : vector<1xf32> to vector<1x1xf32>
      %cst_113 = arith.constant 0.000000e+00 : f32
      %246 = vector.shape_cast %245 : vector<1x1xf32> to vector<1x1x1xf32>
      %247 = vector.broadcast %246 : vector<1x1x1xf32> to vector<1x1x128xf32>
      %248 = vector.broadcast %cst_113 : f32 to vector<1x1x128xf32>
      %249 = arith.select %242, %247, %248 : vector<1x1x128xi1>, vector<1x1x128xf32>
      %250 = arith.addf %240, %249 : vector<1x1x128xf32>
      %c4_i32 = arith.constant 4 : i32
      %251 = vector.broadcast %c4_i32 : i32 to vector<1x1x128xi32>
      %252 = arith.cmpi eq, %211, %251 : vector<1x1x128xi32>
      %c0_114 = arith.constant 0 : index
      %c0_115 = arith.constant 0 : index
      %253 = vector.load %arg10[%c0_114, %c0_115] : memref<1x256xf32, #tpu.memory_space<vmem>>, vector<1x256xf32>
      %cst_116 = arith.constant dense<0.000000e+00> : vector<1xf32>
      %254 = vector.multi_reduction <add>, %253, %cst_116 [1] : vector<1x256xf32> to vector<1xf32>
      %255 = vector.shape_cast %254 : vector<1xf32> to vector<1x1xf32>
      %cst_117 = arith.constant 0.000000e+00 : f32
      %256 = vector.shape_cast %255 : vector<1x1xf32> to vector<1x1x1xf32>
      %257 = vector.broadcast %256 : vector<1x1x1xf32> to vector<1x1x128xf32>
      %258 = vector.broadcast %cst_117 : f32 to vector<1x1x128xf32>
      %259 = arith.select %252, %257, %258 : vector<1x1x128xi1>, vector<1x1x128xf32>
      %260 = arith.addf %250, %259 : vector<1x1x128xf32>
      %c0_118 = arith.constant 0 : index
      %c0_119 = arith.constant 0 : index
      %c0_120 = arith.constant 0 : index
      %261 = vector.load %arg5[%c0_118, %c0_119, %c0_120] : memref<1x1x128xf32, #tpu.memory_space<vmem>>, vector<1x1x128xf32>
      tpu.vector_store %arg5[%c0_118, %c0_119, %c0_120], %260 {strides = array<i32>} : memref<1x1x128xf32, #tpu.memory_space<vmem>>, vector<1x1x128xf32>,
    } else {
    }
    return
  }
  func.func @transform_0(%arg0: i32, %arg1: i32) -> (i32, i32) {
    %c1_i32 = arith.constant 1 : i32
    %0 = arith.muli %arg0, %c1_i32 : i32
    %1 = arith.addi %0, %arg1 : i32
    %c0_i32 = arith.constant 0 : i32
    %c0_i32_0 = arith.constant 0 : i32
    return %c0_i32, %1 : i32, i32
  }
  func.func @transform_1(%arg0: i32, %arg1: i32) -> (i32, i32) {
    %c1_i32 = arith.constant 1 : i32
    %0 = arith.muli %arg0, %c1_i32 : i32
    %1 = arith.addi %0, %arg1 : i32
    %c0_i32 = arith.constant 0 : i32
    %c0_i32_0 = arith.constant 0 : i32
    return %c0_i32, %1 : i32, i32
  }
  func.func @transform_2(%arg0: i32, %arg1: i32) -> (i32, i32) {
    %c0_i32 = arith.constant 0 : i32
    %c0_i32_0 = arith.constant 0 : i32
    %c0_i32_1 = arith.constant 0 : i32
    return %c0_i32, %c0_i32_0 : i32, i32
  }
  func.func @transform_3(%arg0: i32, %arg1: i32) -> (i32, i32, i32) {
    %c0_i32 = arith.constant 0 : i32
    %c0_i32_0 = arith.constant 0 : i32
    %c0_i32_1 = arith.constant 0 : i32
    return %arg0, %c0_i32, %c0_i32_0 : i32, i32, i32
  }
}

</mosaic_0001>

<bundles_post_ra>
// kernel: tpu_custom_call.1
= control target key start
LH: loop header
LB: loop body
LE: loop exit
PB: predicated region body
PF: predicated region fallthrough
CT: control target
= control target key end

     0   :  { %s1814_s0 = inlined_call_operand.hbm [shape: f32[4,512], index: 0, kind: input, shape index: {}]   ;;  %s1815_s1 = inlined_call_operand.hbm [shape: f32[16,512], index: 1, kind: input, shape index: {}]   ;;  %s1816_s2 = inlined_call_operand.hbm [shape: f32[8,128], index: 2, kind: input, shape index: {}]   ;;  %s1817_s3 = inlined_call_operand.hbm [shape: f32[2,1,128], index: 3, kind: output, shape index: {}]  }
   0x1   :  { %1823 = sst [smem:[#allocation20_spill]] %s1814_s0 }
   0x2   :  { %1824 = sst [smem:[#allocation21_spill]] %s1816_s2 }
   0x3   :  { %8 = vsyncpa [#allocation8], 0 }
   0x4   :  { %10 = vsyncpa [#allocation8 + $0x1], 0 }
   0x5   :  { %11 = vsyncpa [#allocation11], 0 }
   0x6   :  { %13 = vsyncpa [#allocation11 + $0x1], 0 }
   0x7   :  { %14 = vsyncpa [#allocation9], 0 }
   0x8   :  { %16 = vsyncpa [#allocation9 + $0x1], 0  ;;  %s1254_s12 = smov 0   ;;  %s1256_s13 = smov 0  }
   0x9   :  { %s1258_s14 = smov 0   ;;  %s1260_s15 = smov 0  }
   0xa   :  { %s1262_s16 = smov 0   ;;  %s1264_s17 = smov 0  }
   0xb LB: > { %s1285_s18 = sadd.s32 4294967295, %s1219_s17   ;;  %s887_s19 = sadd.s32 4294967294, %s1219_s17   ;;  %s1219_s17 = sphi %s1264_s17, %s22_s17   ;;  %s1215_s16 = sphi %s1262_s16, %s1903_s16   ;;  %s1211_s15 = sphi %s1260_s15, %s1902_s15   ;;  %s1207_s14 = sphi %s1258_s14, %s1901_s14   ;;  %s1203_s13 = sphi %s1256_s13, %s1900_s13   ;;  %s1199_s12 = sphi %s1254_s12, %s1899_s12  }
   0xc   : > { %p56_p0 = scmp.ne.s32.totalorder %s1203_s13, %s1199_s12  ;;  %p57_p1 = scmp.eq.s32.totalorder %s1285_s18, 0 }
   0xd   : > { %p129_p2 = scmp.eq.s32.totalorder %s1285_s18, 1  ;;  %p135_p3 = scmp.eq.s32.totalorder %s887_s19, 1 }
   0xe   : > { %p1294_p4 = por %p57_p1, %p56_p0  ;;  %p888_p5 = scmp.ge.s32.totalorder %s1219_s17, 1 }
   0xf   : > { %p1299_p6 = por %p135_p3, %p56_p0  ;;  %p142_p7 = scmp.lt.s32.totalorder %s1219_s17, 3 }
  0x10   : > { %s1827_s2 = sld [smem:[#allocation21_spill]]  ;;  %p890_p9 = scmp.ge.s32.totalorder %s1219_s17, 2 }
  0x11   : > { %p1307_p8 = pnand %p888_p5, %p142_p7  ;;  %s1221_s26 = smov [#allocation12]  }
  0x12   : > { %s156_s27 = sshll.u32 %s1221_s26, 4  ;;  %s34_s28 = sadd.s32 1, %s1215_s16  ;;  %s157_s27 = int_to_ptr.vmem [resolvable:$true] %s156_s27 }
  0x13   : > { %p932_p10 = pneg %p1307_p8  ;;  %p36_p12 = scmp.ge.s32.totalorder %s34_s28, 2 }
  0x14   : > { %s43_s29 = sadd.s32 1, %s1207_s14  ;;  %p50_p13 = scmp.ne.s32.totalorder %s1207_s14, %s1203_s13 }
  0x15   : > { %p933_p11 = pnand %p932_p10, %p57_p1  ;;  %p51_p0 = scmp.eq.s32.totalorder %s1219_s17, 0 }
  0x16   : > { %s154_s24 = sshll.u32 %s1827_s2, 4  ;;  %s1905_s28 = smov (%p36_p12, %s34_s28), 0  ;;  %s155_s24 = int_to_ptr.hbm [resolvable:$true] %s154_s24 }
  0x17   : > { %935 = dma.hbm_to_vmem [thread:$0]  (!%p933_p11), %s155_s24, 128, %s157_s27, [#allocation11]  }
  0x18   : > { %1829 = sst [smem:[#allocation18_spill]] %s1905_s28  ;;  %p1323_p3 = por %p51_p0, %p50_p13 }
  0x19   : > { %p1329_p5 = por %p129_p2, %p50_p13  ;;  %s40_s5 = ssub.s32 %s1215_s16, %s1905_s28 }
  0x1a   : > { %p948_p7 = scmp.lt.s32.totalorder %s1219_s17, 2  ;;  %p41_p10 = scmp.eq.s32.totalorder %s40_s5, 0 }
  0x1b   : > { %s167_s6 = sand.u32 1, %s1207_s14   ;;  %s920_s9 = sshll.u32 %s1215_s16, 3 }
  0x1c   : > { %s891_s7 = sshll.u32 %s167_s6, 3  ;;  %s1833_s0 = sld [smem:[#allocation20_spill]] }
  0x1d   : > { %s1338_s8 = scalar_select %p41_p10, %s1207_s14, %s43_s29  }
  0x1e   : > { %s171_s22 = scalar_lea.vmem [#allocation7], %s891_s7  ;;  %p1346_p2 = pnand %p948_p7, %p1323_p3 }
  0x1f   : > { %1832 = sst [smem:[#allocation19_spill]] %s1338_s8  ;;  %s181_s23 = sshll.u32 %s171_s22, 4  ;;  %s182_s23 = int_to_ptr.vmem [resolvable:$true] %s181_s23 }
  0x20   : > { %s894_s27 = sshll.u32 %s167_s6, 5  ;;  %s921_s29 = sshll.u32 %s1215_s16, 4 }
  0x21   : > { %s168_s5 = scalar_lea.sflag [#allocation8], %s167_s6  ;;  %s198_s7 = scalar_lea.hbm %s1815_s1, %s921_s29 }
  0x22   : > { %s177_s19 = scalar_lea.hbm %s1833_s0, %s920_s9  ;;  %s192_s11 = scalar_lea.vmem [#allocation10], %s894_s27 }
  0x23   : > { %s179_s24 = sshll.u32 %s177_s19, 4  ;;  %s201_s19 = sshll.u32 %s192_s11, 4  ;;  %s180_s24 = int_to_ptr.hbm [resolvable:$true] %s179_s24  ;;  %s202_s19 = int_to_ptr.vmem [resolvable:$true] %s201_s19 }
  0x24   : > { %939 = dma.hbm_to_vmem [thread:$0]  (!%p1346_p2), %s180_s24, 128, %s182_s23, %s168_s5  }
  0x25   : > { %s199_s22 = sshll.u32 %s198_s7, 4  ;;  %s188_s30 = sand.u32 1, %s1219_s17   ;;  %s200_s22 = int_to_ptr.hbm [resolvable:$true] %s199_s22 }
  0x26   : > { %s189_s0 = scalar_lea.sflag [#allocation11], %s188_s30  ;;  %s1222_s2 = smov 512  }
  0x27   : > { %s1223_s28 = smov 256   ;;  %s1224_s8 = smov 16  }
  0x28   : > { %942 = dma.hbm_to_vmem [thread:$0]  (!%p1346_p2), %s200_s22, 512, %s202_s19, %s189_s0, %s1222_s2, %s1223_s28, %s1224_s8  }
  0x29   : > { %213 = sbr.rel (%p1307_p8) target bundleno = 377 (0x179), region = 32  ;;  %s1362_s6 = sand.u32 (!%p1307_p8), 1, %s1203_s13  }
  0x2a   : > { %s898_s23 = sshll.u32 (!%p1307_p8), %s1362_s6, 3  ;;  %s216_s24 = scalar_lea.sflag (!%p1307_p8), [#allocation8], %s1362_s6 }
  0x2b   : > { %s1366_s27 = scalar_lea.vmem (!%p1307_p8), [#allocation7], %s898_s23 }
  0x2e   : > { %1182 = dma.done.wait (%p1294_p4), %s216_s24, 128  }
  0x2f   : > { %1184 = vsyncadd (%p1294_p4), %s216_s24, 4294967168  ;;  %s225_s0 = sand.u32 1, %s1285_s18   ;;  %s899_s2 = sshll.u32 %s1362_s6, 5 }
  0x30   : > { %s226_s25 = scalar_lea.sflag [#allocation11], %s225_s0  ;;  %s1374_s28 = scalar_lea.vmem [#allocation10], %s899_s2 }
  0x31   : > { %1186 = dma.done.wait (%p1294_p4), %s226_s25, 512  }
  0x32   : > { %1188 = vsyncadd (%p1294_p4), %s226_s25, 4294966784 }
  0x33   : > { %1190 = dma.done.wait (%p57_p1), [#allocation11], 128  }
  0x34   : > { %1192 = vsyncadd (%p57_p1), [#allocation11], 4294967168  ;;  %v1225_v0 = vmov 0   ;;  %v1226_v1 = vmov 2   ;;  %v1227_v2 = vmov 4   ;;  %v1228_v4 = vmov 1   ;;  %s774_s8 = scalar_lea.hbm %s1817_s3, %s1211_s15 }
  0x35   : > { %1012 = vset.pattern.permute.xlu0 %v1225_v0  ;;  %1014 = vset.pattern.permute.xlu1 %v1226_v1  ;;  %v316_v3 = vld [vmem:[#allocation12] sm:$0x7f]  ;;  %v1229_v5 = vmov 3   ;;  %v1230_v6 = vmov 5   ;;  %v1231_v7 = vmov 6   ;;  %v1232_v8 = vmov 7  }
  0x36   : > { %1016 = vset.pattern.permute.xlu2 %v1227_v2  ;;  %325 = vperm.xlu0 %1012, %v316_v3   ;;  %v908_v9 = vld [vmem:[%s1374_s28 + $0x13] ss:$8 sm:$0x3]  ;;  %v909_v10 = vld [vmem:[%s1374_s28 + $0x14] ss:$8 sm:$0x3] }
  0x37   : > { %353 = vperm.xlu1 %1014, %v316_v3   ;;  %381 = vperm.xlu2 %1016, %v316_v3   ;;  %v452_v11 = vmul.f32 %v908_v9, %v908_v9  ;;  %v453_v12 = vmul.f32 %v909_v10, %v909_v10  ;;  %v910_v14 = vld [vmem:[%s1374_s28 + $0x15] ss:$8 sm:$0x3]  ;;  %v903_v20 = vld [vmem:[%s1366_s27 + $0x3] ss:$4 sm:$0x3] }
  0x38   : > { %vm484_vm0 = vcmp.ne.f32.partialorder %v910_v14, 0.0  ;;  %v446_v19 = vld [vmem:[%s1374_s28 + $0x10] sm:$0x38]  ;;  %vm374_vm1 = vcmp.eq.f32.partialorder %v903_v20, 4.0  ;;  %v447_v21 = vld [vmem:[%s1374_s28 + $0x18] sm:$0x38] }
  0x39   : > { %v454_v13 = vadd.f32 %v453_v12, %v452_v11  ;;  %v485_v16 = vsel %vm484_vm0, %v910_v14, 1e-30  ;;  %vm529_vm2 = vcmp.ne.f32.partialorder %v446_v19, 0.0  ;;  %vm317_vm3 = vcmp.eq.f32.partialorder %v903_v20, 0.0  ;;  %s261_s26 = scalar_lea.vmem [#allocation13], %s1362_s6  ;;  %s778_s5 = sshll.u32 %s774_s8, 4  ;;  %s779_s5 = int_to_ptr.hbm [resolvable:$true] %s778_s5 }
  0x3a   : > { %v1391_v17 = vperm.slane %v485_v16, 0  ;;  %v375_v23 = vsel %vm374_vm1, 1, %v1225_v0  ;;  %vm332_vm4 = vcmp.eq.f32.partialorder %v903_v20, 1.0  ;;  %vm388_vm5 = vcmp.eq.f32.partialorder %v903_v20, 5.0  ;;  %s776_s29 = sshll.u32 %s261_s26, 4  ;;  %s766_s10 = scalar_lea.sflag [#allocation9], %s1362_s6  ;;  %s777_s29 = int_to_ptr.vmem [resolvable:$true] %s776_s29 }
  0x3b   : > { %v1388_v15 = vmax.f32 %v454_v13, 1e-30  ;;  %vm530_vm6 = vcmp.ne.f32.partialorder %v447_v21, 0.0  ;;  %v1406_v26 = vsel %vm529_vm2, %v446_v19, 1e-30  ;;  %v318_v27 = vsel %vm317_vm3, 1, %v1225_v0 }
  0x3c   : > { %vm346_vm7 = vcmp.eq.f32.partialorder %v903_v20, 2.0  ;;  %v1410_v29 = vperm.slane %v485_v16, 1  ;;  %v376_v30 = vperm.slane %v375_v23, 0  ;;  %v333_v31 = vsel %vm332_vm4, 1, %v1225_v0  ;;  %s1143_s9 = sshra.s32 %s779_s5, 4  ;;  %s1149_s19 = scalar_lea.hbm %s1817_s3, 2  ;;  %s1144_s9 = int_to_ptr.hbm [resolvable:$true] %s1143_s9 }
  0x3d   : > { %1021 = vrsqrt.f32 %v1388_v15  ;;  %vm360_vm8 = vcmp.eq.f32.partialorder %v903_v20, 3.0  ;;  %v389_v32 = vsel %vm388_vm5, 1, %v1225_v0  ;;  %v1416_v34 = vsel %vm530_vm6, %v447_v21, 1e-30  ;;  %s1145_s7 = scalar_lea.hbm %s1144_s9, 1  ;;  %p1150_p11 = scmp.lt.s32.totalorder %s1144_s9, %s1817_s3 }
  0x3e   : > { %1013 = vset.pattern.permute.xlu0 %v1228_v4  ;;  %1023 = vrcp.f32 %v1391_v17  ;;  %v319_v35 = vperm.slane %v318_v27, 0  ;;  %v320_v36 = vperm.slane %v318_v27, 1  ;;  %v347_v37 = vsel %vm346_vm7, 1, %v1225_v0  ;;  %p1146_p1 = scmp.ne.s32.totalorder %s1144_s9, %s1145_s7  ;;  %p1151_p12 = scmp.lt.s32.totalorder %s1149_s19, %s1145_s7 }
  0x3f   : > { %1015 = vset.pattern.permute.xlu1 %v1229_v5  ;;  %339 = vperm.xlu0 %1013, %v316_v3   ;;  %1025 = vrcp.f32 %v1406_v26  ;;  %v377_v38 = vperm.slane %v375_v23, 1  ;;  %v334_v39 = vperm.slane %v333_v31, 0  ;;  %v335_v40 = vperm.slane %v333_v31, 1 }
  0x40   : > { %367 = vperm.xlu1 %1015, %v316_v3   ;;  %1017 = vset.pattern.permute.xlu2 %v1230_v6  ;;  %1027 = vrcp.f32 %v1410_v29  ;;  %v361_v42 = vsel %vm360_vm8, 1, %v1225_v0  ;;  %v390_v43 = vperm.slane %v389_v32, 0  ;;  %vm402_vm9 = vcmp.eq.f32.partialorder %v903_v20, 6.0  ;;  %p1147_p4 = pnand %p1146_p1, %p1329_p5  ;;  %p1152_p13 = por %p1151_p12, %p1150_p11 }
  0x41   : > { %395 = vperm.xlu2 %1017, %v316_v3   ;;  %1029 = vrcp.f32 %v1416_v34  ;;  %vm1423_vm10 = vcmp.eq.s32.totalorder %v376_v30, 1  ;;  %v391_v45 = vperm.slane %v389_v32, 1  ;;  %vm416_vm11 = vcmp.eq.f32.partialorder %v903_v20, 7.0  ;;  %v1508_v20 = vld [vmem:[%s1374_s28 + $0x12] ss:$8 sm:$0x3] }
  0x42   : > { %v348_v47 = vperm.slane %v347_v37, 0  ;;  %v349_v48 = vperm.slane %v347_v37, 1  ;;  %vm1427_vm12 = vcmp.eq.s32.totalorder %v377_v38, 1  ;;  %vm1433_vm13 = vcmp.eq.s32.totalorder %v319_v35, 1  ;;  %p1148_p8 = pneg %p1147_p4 }
  0x43   : > { %v1393_v18 = vpop.eup %1021  ;;  %v362_v52 = vperm.slane %v361_v42, 0  ;;  %v363_v53 = vperm.slane %v361_v42, 1  ;;  %v403_v54 = vsel %vm402_vm9, 1, %v1225_v0  ;;  %vm1438_vm14 = vcmp.eq.s32.totalorder %v320_v36, 1 }
  0x44   : > { %v457_v22 = vmul.f32 %v1393_v18, %v1388_v15  ;;  %v1402_v24 = vpop.eup %1023  ;;  %vm1445_vm15 = vcmp.eq.s32.totalorder %v334_v39, 1  ;;  %vm1449_vm0 = vcmp.eq.s32.totalorder %v335_v40, 1  ;;  %vm1455_vm1 = vcmp.eq.s32.totalorder %v390_v43, 1  ;;  %v902_v30 = vld [vmem:[%s1366_s27 + $0x2] ss:$4 sm:$0x3]  ;;  %p1153_p0 = pnand %p1152_p13, %p1148_p8 }
  0x45   : > { %v492_v33 = vmul.f32 %v1402_v24, %v1391_v17  ;;  %v1431_v50 = vpop.eup %1025  ;;  %v1461_v62 = vsel %vm416_vm11, 1, %v1225_v0  ;;  %vm1467_vm2 = vcmp.eq.s32.totalorder %v391_v45, 1  ;;  %vm462_vm3 = vweird.f32 %v1388_v15  ;;  %v438_v39 = vld [vmem:[%s1374_s28 + $0x10] sm:$0x3] }
  0x46   : > { %v458_v28 = vmul.f32 %v1393_v18, %v457_v22  ;;  %v1463_v63 = vpop.eup %1027  ;;  %vm463_vm4 = vweird.f32 %v1393_v18  ;;  %vm1476_vm5 = vcmp.eq.s32.totalorder %v348_v47, 1  ;;  %vm1480_vm6 = vcmp.eq.s32.totalorder %v349_v48, 1 }
  0x47   : > { %1020 = vset.pattern.permute.xlu0 %v1232_v8  ;;  %v493_v46 = vsub.f32 1.0, %v492_v33  ;;  %v1474_v5 = vpop.eup %1029  ;;  %v405_v9 = vperm.slane %v403_v54, 1  ;;  %v534_v10 = vmul.f32 %v1431_v50, %v1406_v26  ;;  %vm497_vm8 = vweird.f32 %v1402_v24  ;;  %vm464_vm7 = vmor %vm462_vm3, %vm463_vm4 }
  0x48   : > { %1018 = vset.pattern.permute.xlu1 %v1231_v7  ;;  %v459_v41 = vmul.f32 0.5, %v458_v28  ;;  %v418_v12 = vperm.slane %v1461_v62, 0  ;;  %vm1493_vm9 = vcmp.eq.s32.totalorder %v362_v52, 1  ;;  %vm1497_vm11 = vcmp.eq.s32.totalorder %v363_v53, 1 }
  0x49   : > { %409 = vperm.xlu1 %1018, %v316_v3   ;;  %1019 = vset.pattern.permute.xlu2 %v1232_v8  ;;  %v494_v4 = vmul.f32 %v1402_v24, %v493_v46  ;;  %v404_v8 = vperm.slane %v403_v54, 0  ;;  %v507_v21 = vmul.f32 %v1463_v63, %v1410_v29  ;;  %v419_v22 = vperm.slane %v1461_v62, 1 }
  0x4a   : > { %423 = vperm.xlu2 %1019, %v316_v3   ;;  %v460_v55 = vsub.f32 1.5, %v459_v41  ;;  %v502_v27 = vand.u32 2147483648, %v1391_v17  ;;  %v549_v28 = vmul.f32 %v1474_v5, %v1416_v34  ;;  %v500_v15 = vand.u32 2147483647, %v1391_v17 }
  0x4b   : > { %v1518_v23 = vadd.f32 %v1402_v24, %v494_v4  ;;  %v535_v32 = vsub.f32 1.0, %v534_v10  ;;  %v290_v33 = vadd.f32 1e-06, %v902_v30  ;;  %vm539_vm4 = vweird.f32 %v1431_v50 }
  0x4c   : > { %v461_v11 = vmul.f32 %v1393_v18, %v460_v55  ;;  %v478_v36 = vperm.slane %v1508_v20, 0  ;;  %v479_v37 = vperm.slane %v1508_v20, 1  ;;  %v508_v38 = vsub.f32 1.0, %v507_v21 }
  0x4d   : > { %vm1543_vm3 = vcmp.eq.s32.totalorder %v404_v8, 1  ;;  %v1555_v41 = vor.u32 1.1754944e-38, %v502_v27  ;;  %v517_v42 = vand.u32 2147483648, %v1410_v29  ;;  %v550_v43 = vsub.f32 1.0, %v549_v28 }
  0x4e   : > { %v1533_v35 = vsel %vm464_vm7, %v1393_v18, %v461_v11  ;;  %vm1547_vm7 = vcmp.eq.s32.totalorder %v405_v9, 1  ;;  %v536_v48 = vmul.f32 %v1431_v50, %v535_v32  ;;  %v542_v52 = vand.u32 2147483647, %v1406_v26 }
  0x4f   : > { %1031 = vlog2.f32 %v290_v33  ;;  %v302_v4 = vsub.f32 1.0, %v902_v30  ;;  %v509_v9 = vmul.f32 %v1463_v63, %v508_v38  ;;  %v544_v10 = vand.u32 2147483648, %v1406_v26 }
  0x50   : > { %v1576_v58 = vor.u32 1.1754944e-38, %v517_v42  ;;  %v551_v59 = vmul.f32 %v1474_v5, %v550_v43  ;;  %v537_v0 = vadd.f32 %v1431_v50, %v536_v48  ;;  %v559_v6 = vand.u32 2147483648, %v1416_v34 }
  0x51   : > { %v270_v32 = vlaneseq  ;;  %v1233_v49 = vmov 0.0  }
  0x52   : > { %v552_v14 = vadd.f32 %v1474_v5, %v551_v59 }
  0x55   : > { %v1032_v33 = vpop.eup %1031 }
  0x91   : > { %v1404_v25 = vpop.permute.xlu2 %381 }
  0x92   : > { %v384_v57 = vsel %vm1423_vm10, %v1404_v25, 0.0  ;;  %v385_v7 = vsel %vm1427_vm12, %v1404_v25, 0.0  ;;  %vm553_vm12 = vweird.f32 %v1416_v34  ;;  %vm554_vm10 = vweird.f32 %v1474_v5 }
  0x9b   : > { %v1453_v60 = vpop.permute.xlu2 %395 }
  0x9c   : > { %v398_v16 = vsel %vm1455_vm1, %v1453_v60, 0.0  ;;  %v399_v19 = vsel %vm1467_vm2, %v1453_v60, 0.0  ;;  %vm1859_vm2 = vweird.f32 %v1391_v17  ;;  %v515_v17 = vand.u32 2147483647, %v1410_v29 }
  0x9d   : > { %vm1526_vm1 = vmor %vm1859_vm2, %vm497_vm8  ;;  %vm511_vm2 = vweird.f32 %v1410_v29  ;;  %vm512_vm8 = vweird.f32 %v1463_v63 }
  0x9e   : > { %v499_v40 = vsel %vm1526_vm1, %v1402_v24, %v1518_v23  ;;  %vm598_vm1 = vcmask 1041408  }
  0xa8   : > { %v326_v1 = vpop.permute.xlu0 %325 }
  0xa9   : > { %v1465_v2 = vpop.permute.xlu1 %353  ;;  %v328_v45 = vsel %vm1433_vm13, %v326_v1, 0.0  ;;  %v329_v53 = vsel %vm1438_vm14, %v326_v1, 0.0  ;;  %vm1579_vm13 = vcmp.eq.f32.partialorder %v500_v15, 8.507059e+37  ;;  %vm1583_vm14 = vcmp.eq.f32.partialorder %v515_v17, 8.507059e+37 }
  0xaa   : > { %v356_v11 = vsel %vm1476_vm5, %v1465_v2, 0.0  ;;  %v357_v56 = vsel %vm1480_vm6, %v1465_v2, 0.0  ;;  %v303_v15 = vadd.f32 1e-06, %v302_v4  ;;  %v510_v17 = vadd.f32 %v1463_v63, %v509_v9 }
  0xab   : > { %vm1602_vm5 = vcmp.eq.f32.partialorder %v542_v52, 8.507059e+37  ;;  %vm1610_vm6 = vcmp.lt.s32.totalorder %v270_v32, 256  ;;  %v470_v9 = vperm.slane %v1533_v35, 1 }
  0xac   : > { %1033 = vlog2.f32 %v303_v15  ;;  %276 = vst.msk [vmem:[#allocation4] sm:$0x3] %vm1610_vm6, %v1233_v49 }
  0xad   : > { %274 = vst.msk [vmem:[#allocation2] sm:$0x3] %vm1610_vm6, %v1233_v49 }
  0xae   : > { %275 = vst.msk [vmem:[#allocation3] sm:$0x3] %vm1610_vm6, %v1233_v49 }
  0xaf   : > { %277 = vst.msk [vmem:[#allocation5] sm:$0x3] %vm1610_vm6, %v1233_v49 }
  0xb0   : > { %278 = vst.msk [vmem:[#allocation6] sm:$0x3] %vm1610_vm6, %v1233_v49 }
  0xb1   : > { %v340_v46 = vpop.permute.xlu0 %339 }
  0xb2   : > { %v368_v47 = vpop.permute.xlu1 %367  ;;  %v342_v54 = vsel %vm1445_vm15, %v340_v46, 0.0  ;;  %v343_v55 = vsel %vm1449_vm0, %v340_v46, 0.0  ;;  %vm1870_vm15 = vweird.f32 %v1406_v26  ;;  %v279_v46 = vld [vmem:[%s1366_s27] ss:$4 sm:$0x3]  ;;  %v1034_v4 = vpop.eup %1033 }
  0xb3   : > { %v344_v8 = vadd.f32 %v342_v54, %v328_v45  ;;  %v345_v51 = vadd.f32 %v343_v55, %v329_v53  ;;  %v370_v2 = vsel %vm1493_vm9, %v368_v47, 0.0  ;;  %v371_v30 = vsel %vm1497_vm11, %v368_v47, 0.0  ;;  %vm1598_vm0 = vmor %vm1870_vm15, %vm539_vm4  ;;  %v424_v53 = vpop.permute.xlu2 %423  ;;  %v310_v23 = vld [vmem:[#allocation4] sm:$0x3] }
  0xb4   : > { %v557_v45 = vand.u32 2147483647, %v1416_v34  ;;  %vm1626_vm4 = vmor %vm553_vm12, %vm554_vm10  ;;  %vm1632_vm15 = vcmp.eq.s32.totalorder %v418_v12, 1  ;;  %vm1638_vm9 = vcmp.eq.s32.totalorder %v419_v22, 1  ;;  %v541_v62 = vsel %vm1598_vm0, %v1431_v50, %v537_v0 }
  0xb5   : > { %v358_v1 = vadd.f32 %v356_v11, %v344_v8  ;;  %v359_v21 = vadd.f32 %v357_v56, %v345_v51  ;;  %vm1648_vm10 = vmor %vm511_vm2, %vm512_vm8  ;;  %v560_v12 = vor.u32 1.1754944e-38, %v559_v6  ;;  %v292_v22 = vmul.f32 0.6931472, %v1032_v33  ;;  %v439_v8 = vld [vmem:[%s1374_s28 + $0x18] sm:$0x3] }
  0xb6   : > { %v556_v61 = vsel %vm1626_vm4, %v1474_v5, %v552_v14  ;;  %vm1674_vm8 = vcmp.eq.f32.partialorder %v557_v45, 8.507059e+37  ;;  %v426_v60 = vsel %vm1632_vm15, %v424_v53, 0.0  ;;  %v427_v3 = vsel %vm1638_vm9, %v424_v53, 0.0  ;;  %v289_v45 = vld [vmem:[#allocation2] sm:$0x3] }
  0xb7   : > { %v372_v38 = vadd.f32 %v370_v2, %v358_v1  ;;  %v373_v42 = vadd.f32 %v371_v30, %v359_v21  ;;  %v514_v5 = vsel %vm1648_vm10, %v1463_v63, %v510_v17  ;;  %v469_v51 = vperm.slane %v1533_v35, 0  ;;  %v911_v30 = vld [vmem:[%s1374_s28 + $0x16] ss:$8 sm:$0x3] }
  0xb8   : > { %v561_v56 = vsel %vm1674_vm8, %v560_v12, %v556_v61  ;;  %v504_v35 = vsel %vm1579_vm13, %v1555_v41, %v499_v40  ;;  %v519_v1 = vsel %vm1583_vm14, %v1576_v58, %v514_v5  ;;  %v305_v0 = vmul.f32 0.6931472, %v1034_v4  ;;  %v430_v40 = vld [vmem:[%s1374_s28] sm:$0x3]  ;;  %v431_v41 = vld [vmem:[%s1374_s28 + $0x8] sm:$0x3] }
  0xb9   : > { %v386_v26 = vadd.f32 %v384_v57, %v372_v38  ;;  %v387_v48 = vadd.f32 %v385_v7, %v373_v42  ;;  %v545_v7 = vor.u32 1.1754944e-38, %v544_v10  ;;  %v293_v10 = vsub.f32 0.0, %v292_v22  ;;  %v901_v17 = vld [vmem:[%s1366_s27 + $0x1] ss:$4 sm:$0x3] }
  0xba   : > { %v435_v61 = vld [vmem:[%s1374_s28 + $0x8] sm:$0x38]  ;;  %vm644_vm14 = vcmask 1042432  }
  0xbb   : > { %v410_v34 = vpop.permute.xlu1 %409  ;;  %v400_v29 = vadd.f32 %v398_v16, %v386_v26  ;;  %v401_v54 = vadd.f32 %v399_v19, %v387_v48  ;;  %v546_v11 = vsel %vm1602_vm5, %v545_v7, %v541_v62  ;;  %v294_v27 = vmul.f32 %v293_v10, %v279_v46 }
  0xbc   : > { %v412_v50 = vsel %vm1543_vm3, %v410_v34, 0.0  ;;  %v413_v55 = vsel %vm1547_vm7, %v410_v34, 0.0  ;;  %vm286_vm3 = vcmp.gt.f32.partialorder %v279_v46, 0.0  ;;  %v572_v26 = vperm.slane %v911_v30, 0 }
  0xbd   : > { %v414_v19 = vadd.f32 %v412_v50, %v400_v29  ;;  %v415_v18 = vadd.f32 %v413_v55, %v401_v54  ;;  %v1710_v21 = vsel %vm286_vm3, 1.0, %v1233_v49  ;;  %v573_v46 = vperm.slane %v911_v30, 1  ;;  %v301_v49 = vld [vmem:[#allocation3] sm:$0x3]  ;;  %v434_v54 = vld [vmem:[%s1374_s28] sm:$0x38] }
  0xbe   : > { %v295_v48 = vadd.f32 %v294_v27, %v289_v45  ;;  %v905_v29 = vld [vmem:[%s1374_s28 + $0x2] ss:$8 sm:$0x3]  ;;  %v906_v30 = vld [vmem:[%s1374_s28 + $0x6] ss:$8 sm:$0x3] }
  0xbf   : > { %v428_v63 = vadd.f32 %v426_v60, %v414_v19  ;;  %v1697_v59 = vadd.f32 %v427_v3, %v415_v18  ;;  %v313_v18 = vld [vmem:[#allocation5] sm:$0x3]  ;;  %vm685_vm5 = vcmask 1040384  }
  0xc0   : > { %300 = vst.msk [vmem:[#allocation2] sm:$0x3] %vm1610_vm6, %v295_v48 }
  0xc1   : > { %v466_v6 = vsub.f32 %v428_v63, %v438_v39  ;;  %v467_v2 = vsub.f32 %v1697_v59, %v439_v8  ;;  %v482_v31 = vsub.f32 %v428_v63, %v478_v36  ;;  %v483_v24 = vsub.f32 %v1697_v59, %v479_v37 }
  0xc2   : > { %v547_v28 = vmul.f32 %v546_v11, %v428_v63  ;;  %v562_v58 = vmul.f32 %v561_v56, %v1697_v59  ;;  %v311_v36 = vadd.f32 %v1710_v21, %v310_v23  ;;  %v306_v37 = vsub.f32 0.0, %v305_v0 }
  0xc3   : > { %v473_v15 = vmul.f32 %v469_v51, %v466_v6  ;;  %v474_v33 = vmul.f32 %v470_v9, %v467_v2  ;;  %v505_v38 = vmul.f32 %v504_v35, %v482_v31  ;;  %v520_v42 = vmul.f32 %v519_v1, %v483_v24 }
  0xc4   : > { %v563_v43 = vmax.f32 %v547_v28, 1e-30  ;;  %v564_v13 = vmax.f32 %v562_v58, 1e-30  ;;  %312 = vst.msk [vmem:[#allocation4] sm:$0x3] %vm1610_vm6, %v311_v36  ;;  %v307_v34 = vmul.f32 %v901_v17, %v306_v37  ;;  %v576_v16 = vsub.f32 %v428_v63, %v572_v26 }
  0xc5   : > { %v475_v20 = vsub.f32 %v430_v40, %v473_v15  ;;  %v476_v14 = vsub.f32 %v431_v41, %v474_v33  ;;  %523 = vst [vmem:[#allocation1] sm:$0xff] %v505_v38  ;;  %v577_v8 = vsub.f32 %v1697_v59, %v573_v46  ;;  %v314_v1 = vadd.f32 %v901_v17, %v313_v18 }
  0xc6   : > { %524 = vst [vmem:[#allocation1 + $0x9] sm:$0xff] %v520_v42  ;;  %1035 = vlog2.f32 %v563_v43  ;;  %v308_v19 = vadd.f32 %v307_v34, %v301_v49 }
  0xc7   : > { %1037 = vlog2.f32 %v564_v13  ;;  %v586_v52 = vand.u32 2147483647, %v475_v20  ;;  %v587_v53 = vand.u32 2147483647, %v476_v14  ;;  %v590_v44 = vmul.f32 0.5, %v475_v20 }
  0xc8   : > { %v591_v25 = vmul.f32 0.5, %v476_v14  ;;  %309 = vst.msk [vmem:[#allocation3] sm:$0x3] %vm1610_vm6, %v308_v19  ;;  %v696_v57 = vld [vmem:[#allocation2] sm:$0x3] }
  0xc9   : > { %vm588_vm7 = vcmp.lt.f32.partialorder %v586_v52, 1.0  ;;  %vm1726_vm13 = vcmp.lt.f32.partialorder %v587_v53, 1.0  ;;  %v592_v62 = vmul.f32 %v590_v44, %v475_v20  ;;  %v912_v7 = vadd.f32 -0.5, %v586_v52  ;;  %315 = vst.msk [vmem:[#allocation5] sm:$0x3] %vm1610_vm6, %v314_v1 }
  0xca   : > { %v593_v12 = vmul.f32 %v591_v25, %v476_v14  ;;  %v913_v22 = vadd.f32 -0.5, %v587_v53 }
  0xcb   : > { %v596_v50 = vsel %vm588_vm7, %v592_v62, %v912_v7  ;;  %v723_v2 = vld [vmem:[#allocation4] sm:$0x3] }
  0xcc   : > { %v1036_v55 = vpop.eup %1035  ;;  %v597_v60 = vsel %vm1726_vm13, %v593_v12, %v913_v22  ;;  %v599_v3 = vsel %vm598_vm1, %v596_v50, 0.0  ;;  %v725_v38 = vperm.slane %v723_v2, 0  ;;  %v726_v48 = vperm.slane %v723_v2, 1 }
  0xcd   : > { %v1038_v39 = vpop.eup %1037  ;;  %v526_v5 = vld [vmem:[#allocation1 + $0x2] ss:$9 sm:$0xff]  ;;  %v566_v4 = vmul.f32 0.6931472, %v1036_v55  ;;  %v600_v51 = vrot.slane %v599_v3, 4  ;;  %v606_v9 = vsel %vm598_vm1, %v597_v60, 0.0 }
  0xce   : > { %v528_v10 = vsub.f32 %v905_v29, %v526_v5  ;;  %v568_v11 = vmul.f32 0.6931472, %v1038_v39  ;;  %580 = vst [vmem:[#allocation1] sm:$0xff] %v576_v16  ;;  %v607_v56 = vrot.slane %v606_v9, 4  ;;  %v729_v44 = vsel %vm685_vm5, %v725_v38, 0.0 }
  0xcf   : > { %v569_v63 = vsub.f32 %v434_v54, %v566_v4  ;;  %581 = vst [vmem:[#allocation1 + $0x9] sm:$0xff] %v577_v8  ;;  %v601_v35 = vadd.f32 %v600_v51, %v599_v3  ;;  %v709_v52 = vld [vmem:[#allocation3] sm:$0x3]  ;;  %v730_v22 = vsel %vm685_vm5, %v726_v48, 0.0  ;;  %v698_v39 = vperm.slane %v696_v57, 0 }
  0xd0   : > { %v570_v0 = vsub.f32 %v435_v61, %v568_v11  ;;  %v608_v6 = vadd.f32 %v607_v56, %v606_v9  ;;  %v613_v31 = vand.u32 2147483647, %v528_v10  ;;  %v615_v59 = vmul.f32 0.5, %v528_v10  ;;  %v737_v29 = vld [vmem:[#allocation5] sm:$0x3] }
  0xd1   : > { %v626_v24 = vand.u32 2147483647, %v569_v63  ;;  %v630_v23 = vmul.f32 0.5, %v569_v63  ;;  %v602_v40 = vrot.slane %v601_v35, 2  ;;  %v711_v34 = vperm.slane %v709_v52, 0 }
  0xd2   : > { %v609_v41 = vrot.slane %v608_v6, 2  ;;  %v627_v27 = vand.u32 2147483647, %v570_v0  ;;  %v631_v58 = vmul.f32 0.5, %v570_v0  ;;  %vm1749_vm11 = vcmp.lt.f32.partialorder %v613_v31, 1.0 }
  0xd3   : > { %vm1742_vm0 = vcmp.lt.f32.partialorder %v626_v24, 1.0  ;;  %v632_v15 = vmul.f32 %v630_v23, %v569_v63  ;;  %v915_v33 = vadd.f32 -0.5, %v626_v24  ;;  %v616_v17 = vmul.f32 %v615_v59, %v528_v10 }
  0xd4   : > { %v914_v43 = vadd.f32 -0.5, %v613_v31  ;;  %vm629_vm4 = vcmp.lt.f32.partialorder %v627_v27, 1.0  ;;  %v603_v36 = vadd.f32 %v602_v40, %v601_v35  ;;  %v633_v20 = vmul.f32 %v631_v58, %v570_v0 }
  0xd5   : > { %v916_v14 = vadd.f32 -0.5, %v627_v27  ;;  %v636_v37 = vsel %vm1742_vm0, %v632_v15, %v915_v33  ;;  %v610_v26 = vadd.f32 %v609_v41, %v608_v6  ;;  %v731_v61 = vadd.f32 %v730_v22, %v729_v44 }
  0xd6   : > { %v583_v13 = vld [vmem:[#allocation1 + $0x6] ss:$9 sm:$0xff]  ;;  %v640_v46 = vrot.slane %v636_v37, 3  ;;  %v604_v62 = vrot.slane %v603_v36, 1  ;;  %v618_v7 = vsel %vm1749_vm11, %v616_v17, %v914_v43  ;;  %v712_v19 = vperm.slane %v709_v52, 1 }
  0xd7   : > { %v585_v45 = vsub.f32 %v906_v30, %v583_v13  ;;  %v637_v53 = vsel %vm629_vm4, %v633_v20, %v916_v14  ;;  %v611_v54 = vrot.slane %v610_v26, 1  ;;  %732 = vadd.xlane.f32.xlu2 %v731_v61  ;;  %v715_v18 = vsel %vm685_vm5, %v711_v34, 0.0 }
  0xd8   : > { %v641_v25 = vrot.slane %v637_v53, 3  ;;  %v645_v49 = vsel %vm644_vm14, %v640_v46, 0.0  ;;  %v699_v5 = vperm.slane %v696_v57, 1  ;;  %v739_v4 = vperm.slane %v737_v29, 0  ;;  %v674_v53 = vld [vmem:[#allocation6] sm:$0x3] }
  0xd9   : > { %v646_v12 = vrot.slane %v645_v49, 4  ;;  %v661_v55 = vand.u32 2147483647, %v585_v45  ;;  %v663_v3 = vmul.f32 0.5, %v585_v45  ;;  %v620_v8 = vperm.slane %v618_v7, 0 }
  0xda   : > { %v652_v50 = vsel %vm644_vm14, %v641_v25, 0.0  ;;  %v716_v10 = vsel %vm685_vm5, %v712_v19, 0.0  ;;  %v605_v11 = vadd.f32 %v604_v62, %v603_v36  ;;  %v612_v56 = vadd.f32 %v611_v54, %v610_v26 }
  0xdb   : > { %v647_v16 = vadd.f32 %v646_v12, %v645_v49  ;;  %v653_v60 = vrot.slane %v652_v50, 4  ;;  %v717_v63 = vadd.f32 %v716_v10, %v715_v18  ;;  %v702_v35 = vsel %vm685_vm5, %v698_v39, 0.0 }
  0xdc   : > { %v703_v6 = vsel %vm685_vm5, %v699_v5, 0.0  ;;  %v740_v2 = vperm.slane %v737_v29, 1  ;;  %v664_v31 = vmul.f32 %v663_v3, %v585_v45  ;;  %v917_v59 = vadd.f32 -0.5, %v661_v55 }
  0xdd   : > { %v648_v51 = vrot.slane %v647_v16, 2  ;;  %v654_v9 = vadd.f32 %v653_v60, %v652_v50  ;;  %718 = vadd.xlane.f32.xlu1 %v717_v63  ;;  %v704_v24 = vadd.f32 %v703_v6, %v702_v35  ;;  %v743_v23 = vsel %vm685_vm5, %v739_v4, 0.0 }
  0xde   : > { %vm662_vm15 = vcmp.lt.f32.partialorder %v661_v55, 1.0  ;;  %v744_v27 = vsel %vm685_vm5, %v740_v2, 0.0  ;;  %v621_v58 = vperm.slane %v618_v7, 1  ;;  %v624_v30 = vadd.f32 %v620_v8, %v605_v11 }
  0xdf   : > { %v649_v1 = vadd.f32 %v648_v51, %v647_v16  ;;  %v655_v0 = vrot.slane %v654_v9, 2  ;;  %705 = vadd.xlane.f32.xlu0 %v704_v24  ;;  %v745_v28 = vadd.f32 %v744_v27, %v743_v23  ;;  %v666_v38 = vsel %vm662_vm15, %v664_v31, %v917_v59 }
  0xe0   : > { %v625_v42 = vadd.f32 %v621_v58, %v612_v56  ;;  %v668_v36 = vperm.slane %v666_v38, 0  ;;  %v669_v20 = vperm.slane %v666_v38, 1  ;;  %v677_v14 = vperm.slane %v1710_v21, 1 }
  0xe1   : > { %v650_v40 = vrot.slane %v649_v1, 1  ;;  %v656_v41 = vadd.f32 %v655_v0, %v654_v9  ;;  %746 = vadd.xlane.f32.xlu2 %v745_v28  ;;  %v676_v26 = vperm.slane %v1710_v21, 0  ;;  %v694_v21 = vand.u32 127, %v270_v32 }
  0xe3   : > { %v651_v15 = vadd.f32 %v650_v40, %v649_v1  ;;  %v657_v33 = vrot.slane %v656_v41, 1  ;;  %vm708_vm9 = vcmp.eq.s32.totalorder %v694_v21, 1  ;;  %vm695_vm10 = vcmp.eq.s32.totalorder %v694_v21, 0 }
  0xe4   : > { %vm736_vm12 = vcmp.eq.s32.totalorder %v694_v21, 3  ;;  %vm750_vm2 = vcmp.eq.s32.totalorder %v694_v21, 4 }
  0xe5   : > { %v658_v17 = vadd.f32 %v657_v33, %v656_v41  ;;  %v659_v43 = vadd.f32 %v651_v15, %v624_v30 }
  0xe7   : > { %v660_v13 = vadd.f32 %v658_v17, %v625_v42  ;;  %v672_v37 = vadd.f32 %v668_v36, %v659_v43 }
  0xe9   : > { %v673_v45 = vadd.f32 %v669_v20, %v660_v13  ;;  %v680_v48 = vmul.f32 %v676_v26, %v672_v37 }
  0xeb   : > { %v681_v46 = vmul.f32 %v677_v14, %v673_v45 }
  0xed   : > { %v684_v52 = vrot.slane %v681_v46, 7 }
  0xef   : > { %v686_v44 = vsel %vm685_vm5, %v680_v48, %v684_v52 }
  0xf0   : > { %v688_v25 = vadd.f32 %v686_v44, %v674_v53 }
  0xf2   : > { %689 = vst.msk [vmem:[#allocation6] sm:$0x3] %vm1610_vm6, %v688_v25  ;;  %vm722_vm6 = vcmp.eq.s32.totalorder %v694_v21, 2 }
  0xf9   : > { %v751_v49 = vld [vmem:[#allocation6] sm:$0x3] }
  0xfa   : > { %v753_v34 = vperm.slane %v751_v49, 0  ;;  %v754_v57 = vperm.slane %v751_v49, 1 }
  0xfc   : > { %v757_v62 = vsel %vm685_vm5, %v753_v34, 0.0  ;;  %v758_v7 = vsel %vm685_vm5, %v754_v57, 0.0 }
  0xfd   : > { %v759_v12 = vadd.f32 %v758_v7, %v757_v62 }
  0xff   : > { %760 = vadd.xlane.f32.xlu0 %v759_v12 }
 0x14a   : > { %v733_v22 = vpop.xlane.xlu2 %732 }
 0x14b   : > { %v734_v61 = vsel %vm722_vm6, %v733_v22, 0.0 }
 0x150   : > { %v719_v29 = vpop.xlane.xlu1 %718 }
 0x151   : > { %v720_v47 = vsel %vm708_vm9, %v719_v29, 0.0 }
 0x152   : > { %v706_v54 = vpop.xlane.xlu0 %705 }
 0x153   : > { %v707_v50 = vsel %vm695_vm10, %v706_v54, 0.0 }
 0x154   : > { %v721_v55 = vadd.f32 %v720_v47, %v707_v50  ;;  %v747_v16 = vpop.xlane.xlu2 %746 }
 0x155   : > { %v748_v32 = vsel %vm736_vm12, %v747_v16, 0.0 }
 0x156   : > { %v735_v60 = vadd.f32 %v734_v61, %v721_v55 }
 0x158   : > { %v749_v3 = vadd.f32 %v748_v32, %v735_v60 }
 0x172   : > { %v761_v19 = vpop.xlane.xlu0 %760 }
 0x173   : > { %v762_v18 = vsel %vm750_vm2, %v761_v19, 0.0 }
 0x174   : > { %v763_v39 = vadd.f32 %v762_v18, %v749_v3 }
 0x176   : > { %764 = vst [vmem:[%s261_s26] sm:$0x1] %v763_v39 }
 0x177   : > { %1156 = shalt.err (!%p1153_p0)
}
 0x178   : > { %930 = dma.vmem_to_hbm [thread:$0]  (%p1329_p5), %s777_s29, 16, %s779_s5, %s766_s10  }
 0x179 PF: > { %s790_s6 = sand.u32 1, %s1199_s12   ;;  %p944_p3 = pnand %p890_p9, %p1299_p6 }
 0x17a   : > { %s791_s23 = scalar_lea.sflag [#allocation9], %s790_s6 }
 0x17b   : > { %p945_p7 = pneg %p944_p3 }
 0x17d   : > { %1194 = dma.done.wait (%p945_p7), %s791_s23, 16  }
 0x17e   : > { %1196 = vsyncadd (%p945_p7), %s791_s23, 4294967280  ;;  %s22_s17 = sadd.s32 1, %s1219_s17   ;;  %s1897_s24 = sld [smem:[#allocation19_spill]] }
 0x17f   : > { %p19_p10 = scmp.ge.s32.totalorder %s22_s17, 4   ;;  %s1898_s4 = sld [smem:[#allocation18_spill]] }
 0x180   : > { %s1899_s12 = smov %s1203_s13  ;;  %s1900_s13 = smov %s1207_s14 }
 0x181   : > { %s1902_s15 = smov %s1215_s16  ;;  %21 = sbr.rel (!%p19_p10) target bundleno = 11 (0xb), region = 114 }
 0x184   : > { %s1901_s14 = smov %s1897_s24 }
 0x185   : > { %s1903_s16 = smov %s1898_s4 }
 0x186   :  { %796 = vsyncpa [#allocation8], 1 }
 0x187   :  { %798 = vsyncpa [#allocation8 + $0x1], 1 }
 0x188   :  { %799 = vsyncpa [#allocation11], 1 }
 0x189   :  { %801 = vsyncpa [#allocation11 + $0x1], 1 }
 0x18a   :  { %802 = vsyncpa [#allocation9], 1 }
 0x18b   :  { %804 = vsyncpa [#allocation9 + $0x1], 1 }

</bundles_post_ra>
